<compile_context>
chip_gen: v6e
topology: v6e:2x2x1
jax: 0.10.0
libtpu: 0.0.40
codegen_flags: <defaults>
</compile_context>

<pallas_src>
import functools

import jax
import jax.numpy as jnp
from jax.experimental import pallas as pl
from jax.experimental.pallas import tpu as pltpu

_NEG_BIG = -1e30      # bias on padded atom lanes -> exp underflows to exactly 0 (f32)
_LANES = 128
_SUBLANES = 8


def _round_up(x, m):
    return ((x + m - 1) // m) * m


# ----------------------------- Pallas kernel -------------------------------
def _categorical_kernel(n_output, atom_pad, write_dist,
                        x_ref, w1_ref, b1_ref, wpf_ref, bpf_ref, red_ref,
                        q_ref, *rest):
    # x_ref   : (tb, D)                      feature-net input   (matmul dtype)
    # w1_ref  : (D, F)                       feature-net weight  (matmul dtype)
    # b1_ref  : (1, F)                       feature-net bias    (f32)
    # wpf_ref : (F, n_output*atom_pad)       fused atom-padded head weights
    # bpf_ref : (1, n_output*atom_pad)       fused head biases (-1e30 on pad lanes)
    # red_ref : (n_output*atom_pad, Rpad)    block-diag [ones | atom values] reducer
    # q_ref   : (tb, n_output)               expected Q values (f32)
    # rest    : (ap_ref,) iff write_dist     (tb, n_output*atom_pad) distributions
    x = x_ref[...]
    h = jnp.dot(x, w1_ref[...], preferred_element_type=jnp.float32) + b1_ref[...]
    h = jnp.maximum(h, 0.0)                       # relu feature network (f32)
    h = h.astype(wpf_ref.dtype)                   # bf16 operands, f32 accumulate

    # One fused MXU call for all action heads.
    logits = jnp.dot(h, wpf_ref[...], preferred_element_type=jnp.float32)
    logits = logits + bpf_ref[...]                # (tb, n_output*atom_pad) f32

    # Per-head numerically stable exp; pad lanes carry a -1e30 bias -> exactly 0,
    # so they never perturb the reductions below.
    e_parts = []
    for i in range(n_output):                     # small static unroll
        li = logits[:, i * atom_pad:(i + 1) * atom_pad]   # 128-aligned lane slice
        m = jnp.max(li, axis=-1, keepdims=True)
        e_parts.append(jnp.exp(li - m))
    # 128-lane-aligned concat: pure vreg placement, no cross-lane data movement.
    e_all = jnp.concatenate(e_parts, axis=-1)

    # One small MXU matmul folds all 2*n_output cross-lane reductions:
    #   r[:, i]            = sum_a e_i                 (softmax denominator)
    #   r[:, n_output + i] = sum_a e_i * atom_value_a  (Q numerator)
    r = jnp.dot(e_all, red_ref[...], preferred_element_type=jnp.float32)
    s = r[:, :n_output]
    num = r[:, n_output:2 * n_output]
    inv = pl.reciprocal(s, approx=True)           # single batched EUP reciprocal
    q_ref[...] = num * inv

    if write_dist:
        ap_ref = rest[0]
        for i in range(n_output):                 # lane-dense 128-wide stores
            lo, hi = i * atom_pad, (i + 1) * atom_pad
            ap_ref[:, lo:hi] = (e_parts[i] * inv[:, i:i + 1]).astype(ap_ref.dtype)


# -------------------------- tiling / VMEM sizing ----------------------------
def _pick_batch_tile(B, D, F, nh, red_cols, n_output,
                     x_bytes, w_bytes, ap_bytes, write_dist):
    """Pick the batch tile and return (tile, vmem_estimate_bytes)."""
    def est(tb):
        b = 2 * tb * D * x_bytes                  # input tile (double-buffered)
        b += 2 * tb * n_output * 4                # q output tile
        if write_dist:
            b += 2 * tb * nh * ap_bytes           # distribution output tile
        b += 2 * tb * nh * 4                      # logits + exp f32 temporaries
        b += (D * F + F * nh) * w_bytes           # resident weights (single-buffered)
        b += (F + nh + nh * red_cols) * 4         # resident f32 biases / reducer
        return b

    if B <= _SUBLANES:
        return B, est(_SUBLANES)
    # >= 2 grid steps of <= 512 rows: shards across v7x's two TensorCores and keeps
    # input/output DMAs pipelined; 512-row tiles sit near the HBM roofline.
    tiles = max(2, pl.cdiv(B, 512))
    tb = _round_up(pl.cdiv(B, tiles), _SUBLANES)
    # VMEM cap (v7x: 64 MiB physical / 32 MiB scoped default; v5e: 16 MiB scoped
    # default): large n_output would otherwise blow the "1024 rows is fine" rule.
    budget = 24 << 20
    while tb > _SUBLANES and est(tb) > budget:
        tb = max(_SUBLANES, _round_up(tb // 2, _SUBLANES))
    return tb, est(tb)


def _run_head(x, w1, b1, wpf, bpf, red, *, n_output, atom_pad, tb,
              write_dist, dist_dtype, vmem_limit, cost):
    B, D = x.shape
    F = w1.shape[1]
    nh = n_output * atom_pad
    grid = (pl.cdiv(B, tb),)            # ragged final block clipped by Pallas

    def call(single_buffer_params):
        def resident(shape):
            zeros = (0,) * len(shape)
            if single_buffer_params:
                # Constant index map -> never re-fetched; don't pay 2x VMEM for it.
                return pl.BlockSpec(shape, lambda i: zeros,
                                    pipeline_mode=pl.Buffered(1))
            return pl.BlockSpec(shape, lambda i: zeros)

        in_specs = [
            pl.BlockSpec((tb, D), lambda i: (i, 0)),
            resident((D, F)),
            resident((1, F)),
            resident((F, nh)),
            resident((1, nh)),
            resident((nh, red.shape[1])),
        ]
        out_specs = pl.BlockSpec((tb, n_output), lambda i: (i, 0))
        out_shape = jax.ShapeDtypeStruct((B, n_output), jnp.float32)
        if write_dist:
            out_specs = (out_specs, pl.BlockSpec((tb, nh), lambda i: (i, 0)))
            out_shape = (out_shape, jax.ShapeDtypeStruct((B, nh), dist_dtype))

        outs = pl.pallas_call(
            functools.partial(_categorical_kernel, n_output, atom_pad, write_dist),
            grid=grid,
            in_specs=in_specs,
            out_specs=out_specs,
            out_shape=out_shape,
            compiler_params=pltpu.CompilerParams(
                dimension_semantics=("parallel",),
                vmem_limit_bytes=vmem_limit),
            cost_estimate=cost,
        )(x, w1, b1, wpf, bpf, red)
        return jax.block_until_ready(outs)

    try:
        return call(True)
    except Exception:   # pl.Buffered(1) unsupported on this jax build -> default buffering
        return call(False)


# ------------------------------ forward wrapper ------------------------------
def categorical_forward(params, state, action=None, get_distribution=False,
                        *, use_bf16=True, dist_dtype=jnp.bfloat16,
                        trim_atoms=True):
    """Mirror of CategoricalNetwork.forward (phi = relu(Linear))."""
    w1, b1, wp, bp, a_values = params
    B, D = state.shape
    n_output, F, n_atoms = wp.shape
    atom_pad = _round_up(n_atoms, _LANES)           # 51 -> 128 lanes
    nh = n_output * atom_pad
    pad = atom_pad - n_atoms

    # ---- fuse + pad per-action head params (do once per update in real use) ----
    wp_f = jnp.transpose(jnp.pad(wp, ((0, 0), (0, 0), (0, pad))), (1, 0, 2))
    wp_f = wp_f.reshape(F, nh)
    bp_f = jnp.pad(bp[:, 0, :], ((0, 0), (0, pad)), constant_values=_NEG_BIG)
    bp_f = bp_f.reshape(1, nh)

    # Block-diagonal reducer: column i sums e over head i's lanes, column
    # n_output+i sums e*atom_values over head i's lanes; lane-padded to 128.
    eye = jnp.eye(n_output, dtype=jnp.float32)
    ones_col = jnp.pad(jnp.ones((n_atoms, 1), jnp.float32), ((0, pad), (0, 0)))
    av_col = jnp.pad(a_values.reshape(n_atoms, 1).astype(jnp.float32),
                     ((0, pad), (0, 0)))
    red = jnp.concatenate([jnp.kron(eye, ones_col), jnp.kron(eye, av_col)], axis=1)
    red_cols = _round_up(2 * n_output, _LANES)
    red = jnp.pad(red, ((0, 0), (0, red_cols - 2 * n_output)))

    mm_dtype = jnp.bfloat16 if use_bf16 else jnp.float32
    x = state.astype(mm_dtype)
    w1_c = w1.astype(mm_dtype)
    wp_c = wp_f.astype(mm_dtype)
    b1_c = b1.astype(jnp.float32)
    bp_c = bp_f.astype(jnp.float32)

    write_dist = bool(get_distribution)             # Q-only path never writes ap
    x_bytes = jnp.dtype(mm_dtype).itemsize
    ap_bytes = jnp.dtype(dist_dtype).itemsize
    tb, vmem_est = _pick_batch_tile(B, D, F, nh, red_cols, n_output,
                                    x_bytes, x_bytes, ap_bytes, write_dist)
    vmem_limit = int(min(56 << 20, max(32 << 20, 2 * vmem_est)))

    flops = 2 * B * (D * F + F * nh + nh * red_cols)
    transcendentals = B * (nh + n_output)           # exp + reciprocal
    bytes_accessed = (B * D * x_bytes + (D * F + F * nh) * x_bytes
                      + (F + nh + nh * red_cols) * 4 + B * n_output * 4
                      + (B * nh * ap_bytes if write_dist else 0))
    cost = pl.CostEstimate(flops=flops, transcendentals=transcendentals,
                           bytes_accessed=bytes_accessed)

    outs = _run_head(x, w1_c, b1_c, wp_c, bp_c, red,
                     n_output=n_output, atom_pad=atom_pad, tb=tb,
                     write_dist=write_dist, dist_dtype=dist_dtype,
                     vmem_limit=vmem_limit, cost=cost)

    # ---- PyTorch-matching glue (pure indexing, stays in plain JAX) ----
    if not write_dist:
        q = outs
        if action is not None:
            # NOTE: jnp.squeeze mirrors torch.squeeze (drops the batch dim when B==1).
            return jnp.squeeze(
                jnp.take_along_axis(q, action.astype(jnp.int32), axis=1))
        return q

    _, a_p2d = outs                                  # q columns are a free byproduct
    a_p = a_p2d.reshape(B, n_output, atom_pad)       # metadata-only minor-dim split
    if trim_atoms:
        # Outside jit this materializes a de-padded copy; inside a jitted consumer
        # XLA fuses the slice. Pass trim_atoms=False to keep the padded layout.
        a_p = a_p[:, :, :n_atoms]
    if action is not None:
        idx = jnp.repeat(action[:, :, None].astype(jnp.int32), a_p.shape[-1], axis=2)
        return jnp.squeeze(jnp.take_along_axis(a_p, idx, axis=1))
    return a_p


# --------------------------- parameter creation -----------------------------
def make_params(key, state_dim, n_features, n_output, n_atoms, v_min, v_max):
    k1, k2, k3, k4 = jax.random.split(key, 4)

    # feature network: Linear(state_dim -> n_features)
    lim1 = (6.0 / (state_dim + n_features)) ** 0.5
    w1 = jax.random.uniform(k1, (state_dim, n_features), jnp.float32, -lim1, lim1)
    b1 = jax.random.uniform(k2, (1, n_features), jnp.float32, -0.05, 0.05)

    # per-action heads: n_output x Linear(n_features -> n_atoms), xavier_uniform
    limp = (6.0 / (n_features + n_atoms)) ** 0.5
    wp = jax.random.uniform(k3, (n_output, n_features, n_atoms), jnp.float32,
                            -limp, limp)
    bp = jax.random.uniform(k4, (n_output, 1, n_atoms), jnp.float32, -0.05, 0.05)

    # atom support: torch.arange(v_min, v_max + eps, delta) -> exactly n_atoms values
    delta = (v_max - v_min) / (n_atoms - 1)
    a_values = (v_min + delta * jnp.arange(n_atoms, dtype=jnp.float32))
    a_values = a_values.reshape(1, n_atoms)

    return (w1, b1, wp, bp, a_values)


# ------------------------------- reference ----------------------------------
def reference_forward(params, state, use_bf16=True):
    w1, b1, wp, bp, a_values = params
    dt = jnp.bfloat16 if use_bf16 else jnp.float32
    x = state.astype(dt)
    h = jnp.dot(x, w1.astype(dt), preferred_element_type=jnp.float32) + b1
    h = jnp.maximum(h, 0.0).astype(dt)
    logits = jnp.einsum('bf,ofa->boa', h, wp.astype(dt),
                        preferred_element_type=jnp.float32) + bp[:, 0, :][None]
    p = jax.nn.softmax(logits, axis=-1)
    q = jnp.sum(p * a_values[0][None, None, :], axis=-1)
    return q, p


if __name__ == "__main__":
    B, STATE_DIM, N_FEATURES = 4, 16, 32
    N_OUTPUT, N_ATOMS = 4, 51
    V_MIN, V_MAX = -10.0, 10.0

    key = jax.random.PRNGKey(0)
    kp, kx, ka, kx2 = jax.random.split(key, 4)
    params = make_params(kp, STATE_DIM, N_FEATURES, N_OUTPUT, N_ATOMS, V_MIN, V_MAX)
    state = jax.random.normal(kx, (B, STATE_DIM), jnp.float32)
    action = jax.random.randint(ka, (B, 1), 0, N_OUTPUT)

    # ---- all forward branches ----
    q = categorical_forward(params, state)                              # (B, n_output)
    q_a = categorical_forward(params, state, action=action)             # (B,)
    a_p = categorical_forward(params, state, get_distribution=True)     # bf16 dist
    a_pf = categorical_forward(params, state, get_distribution=True,
                               dist_dtype=jnp.float32)                  # f32 dist
    a_pa = categorical_forward(params, state, action=action,
                               get_distribution=True)                   # (B, n_atoms)
    jax.block_until_ready((q, q_a, a_p, a_pf, a_pa))

    q_ref, p_ref = reference_forward(params, state)
    assert q.shape == (B, N_OUTPUT) and q.dtype == jnp.float32
    assert q_a.shape == (B,)
    assert a_p.shape == (B, N_OUTPUT, N_ATOMS)
    assert a_pa.shape == (B, N_ATOMS)
    # tolerances account for bf16 MXU operands, the approx EUP reciprocal and
    # (for a_p) the bf16 distribution output.
    assert jnp.allclose(q, q_ref, atol=2e-2), "q mismatch vs reference"
    assert jnp.allclose(a_pf, p_ref, atol=5e-3), "f32 a_p mismatch vs reference"
    assert jnp.allclose(a_p.astype(jnp.float32), p_ref, atol=8e-3), "bf16 a_p mismatch"
    assert jnp.max(jnp.abs(a_pf.sum(-1) - 1.0)) < 1e-2, "softmax not normalized"
    assert jnp.allclose(q_a, q[jnp.arange(B), action[:, 0]], atol=1e-6)
    assert jnp.allclose(a_pa.astype(jnp.float32),
                        p_ref[jnp.arange(B), action[:, 0]], atol=8e-3)

    # ---- multi-tile + ragged final block path (>=2 grid steps, no batch padding) ----
    B2 = 100
    state2 = jax.random.normal(kx2, (B2, STATE_DIM), jnp.float32)
    q2 = categorical_forward(params, state2)
    jax.block_until_ready(q2)
    q2_ref, _ = reference_forward(params, state2)
    assert q2.shape == (B2, N_OUTPUT)
    assert jnp.allclose(q2, q2_ref, atol=2e-2), "multi-tile q mismatch"

    print("KERNEL_OK")
</pallas_src>

<mosaic_0001>
module attributes {stable_mosaic.version = 11 : i64} {
  func.func @_categorical_kernel(%arg0: i32, %arg1: memref<4x16xbf16, #tpu.memory_space<vmem>>, %arg2: memref<16x32xbf16, #tpu.memory_space<vmem>>, %arg3: memref<1x32xf32, #tpu.memory_space<vmem>>, %arg4: memref<32x512xbf16, #tpu.memory_space<vmem>>, %arg5: memref<1x512xf32, #tpu.memory_space<vmem>>, %arg6: memref<512x128xf32, #tpu.memory_space<vmem>>, %arg7: memref<4x4xf32, #tpu.memory_space<vmem>>) attributes {dimension_semantics = [#tpu.dimension_semantics<parallel>], iteration_bounds = array<i64: 1>, scalar_prefetch = 0 : i64, scratch_operands = 0 : i64, tpu.core_type = #tpu.core_type<tc>, window_params = [{transform_indices = @transform_0, window_bounds = array<i64: 4, 16>}, {pipeline_mode = #tpu.pipeline_mode<synchronous>, transform_indices = @transform_1, window_bounds = array<i64: 16, 32>}, {pipeline_mode = #tpu.pipeline_mode<synchronous>, transform_indices = @transform_2, window_bounds = array<i64: 1, 32>}, {pipeline_mode = #tpu.pipeline_mode<synchronous>, transform_indices = @transform_3, window_bounds = array<i64: 32, 512>}, {pipeline_mode = #tpu.pipeline_mode<synchronous>, transform_indices = @transform_4, window_bounds = array<i64: 1, 512>}, {pipeline_mode = #tpu.pipeline_mode<synchronous>, transform_indices = @transform_5, window_bounds = array<i64: 512, 128>}, {transform_indices = @transform_6, window_bounds = array<i64: 4, 4>}]} {
    %c0 = arith.constant 0 : index
    %c0_0 = arith.constant 0 : index
    %0 = vector.load %arg1[%c0, %c0_0] : memref<4x16xbf16, #tpu.memory_space<vmem>>, vector<4x16xbf16>
    %c0_1 = arith.constant 0 : index
    %c0_2 = arith.constant 0 : index
    %1 = vector.load %arg2[%c0_1, %c0_2] : memref<16x32xbf16, #tpu.memory_space<vmem>>, vector<16x32xbf16>
    %cst = arith.constant dense<0.000000e+00> : vector<4x32xf32>
    %2 = tpu.matmul %0, %1, %cst {dimension_numbers = #tpu.dot_dimension_numbers<[1], [0], [0], [1], [0, 0, 1, 1], [], []>} : vector<4x16xbf16>, vector<16x32xbf16>, vector<4x32xf32> -> vector<4x32xf32>
    %c0_3 = arith.constant 0 : index
    %c0_4 = arith.constant 0 : index
    %3 = vector.load %arg3[%c0_3, %c0_4] : memref<1x32xf32, #tpu.memory_space<vmem>>, vector<1x32xf32>
    %4 = vector.broadcast %3 : vector<1x32xf32> to vector<4x32xf32>
    %5 = arith.addf %2, %4 : vector<4x32xf32>
    %cst_5 = arith.constant 0.000000e+00 : f32
    %6 = vector.broadcast %cst_5 : f32 to vector<4x32xf32>
    %7 = arith.maximumf %5, %6 : vector<4x32xf32>
    %8 = arith.truncf %7 : vector<4x32xf32> to vector<4x32xbf16>
    %c0_6 = arith.constant 0 : index
    %c0_7 = arith.constant 0 : index
    %9 = vector.load %arg4[%c0_6, %c0_7] : memref<32x512xbf16, #tpu.memory_space<vmem>>, vector<32x512xbf16>
    %cst_8 = arith.constant dense<0.000000e+00> : vector<4x512xf32>
    %10 = tpu.matmul %8, %9, %cst_8 {dimension_numbers = #tpu.dot_dimension_numbers<[1], [0], [0], [1], [0, 0, 1, 1], [], []>} : vector<4x32xbf16>, vector<32x512xbf16>, vector<4x512xf32> -> vector<4x512xf32>
    %c0_9 = arith.constant 0 : index
    %c0_10 = arith.constant 0 : index
    %11 = vector.load %arg5[%c0_9, %c0_10] : memref<1x512xf32, #tpu.memory_space<vmem>>, vector<1x512xf32>
    %12 = vector.broadcast %11 : vector<1x512xf32> to vector<4x512xf32>
    %13 = arith.addf %10, %12 : vector<4x512xf32>
    %14 = vector.extract_strided_slice %13 {offsets = [0, 0], sizes = [4, 128], strides = [1, 1]} : vector<4x512xf32> to vector<4x128xf32>
    %cst_11 = arith.constant dense<0xFF800000> : vector<4xf32>
    %15 = vector.multi_reduction <maximumf>, %14, %cst_11 [1] : vector<4x128xf32> to vector<4xf32>
    %16 = vector.shape_cast %15 : vector<4xf32> to vector<4x1xf32>
    %17 = vector.broadcast %16 : vector<4x1xf32> to vector<4x128xf32>
    %18 = arith.subf %14, %17 : vector<4x128xf32>
    %19 = math.exp %18 : vector<4x128xf32>
    %20 = vector.extract_strided_slice %13 {offsets = [0, 128], sizes = [4, 128], strides = [1, 1]} : vector<4x512xf32> to vector<4x128xf32>
    %cst_12 = arith.constant dense<0xFF800000> : vector<4xf32>
    %21 = vector.multi_reduction <maximumf>, %20, %cst_12 [1] : vector<4x128xf32> to vector<4xf32>
    %22 = vector.shape_cast %21 : vector<4xf32> to vector<4x1xf32>
    %23 = vector.broadcast %22 : vector<4x1xf32> to vector<4x128xf32>
    %24 = arith.subf %20, %23 : vector<4x128xf32>
    %25 = math.exp %24 : vector<4x128xf32>
    %26 = vector.extract_strided_slice %13 {offsets = [0, 256], sizes = [4, 128], strides = [1, 1]} : vector<4x512xf32> to vector<4x128xf32>
    %cst_13 = arith.constant dense<0xFF800000> : vector<4xf32>
    %27 = vector.multi_reduction <maximumf>, %26, %cst_13 [1] : vector<4x128xf32> to vector<4xf32>
    %28 = vector.shape_cast %27 : vector<4xf32> to vector<4x1xf32>
    %29 = vector.broadcast %28 : vector<4x1xf32> to vector<4x128xf32>
    %30 = arith.subf %26, %29 : vector<4x128xf32>
    %31 = math.exp %30 : vector<4x128xf32>
    %32 = vector.extract_strided_slice %13 {offsets = [0, 384], sizes = [4, 128], strides = [1, 1]} : vector<4x512xf32> to vector<4x128xf32>
    %cst_14 = arith.constant dense<0xFF800000> : vector<4xf32>
    %33 = vector.multi_reduction <maximumf>, %32, %cst_14 [1] : vector<4x128xf32> to vector<4xf32>
    %34 = vector.shape_cast %33 : vector<4xf32> to vector<4x1xf32>
    %35 = vector.broadcast %34 : vector<4x1xf32> to vector<4x128xf32>
    %36 = arith.subf %32, %35 : vector<4x128xf32>
    %37 = math.exp %36 : vector<4x128xf32>
    %38 = tpu.concatenate %19, %25, %31, %37 in 1 : vector<4x128xf32>, vector<4x128xf32>, vector<4x128xf32>, vector<4x128xf32> -> vector<4x512xf32>
    %c0_15 = arith.constant 0 : index
    %c0_16 = arith.constant 0 : index
    %39 = vector.load %arg6[%c0_15, %c0_16] : memref<512x128xf32, #tpu.memory_space<vmem>>, vector<512x128xf32>
    %cst_17 = arith.constant dense<0.000000e+00> : vector<4x128xf32>
    %40 = tpu.matmul %38, %39, %cst_17 {dimension_numbers = #tpu.dot_dimension_numbers<[1], [0], [0], [1], [0, 0, 1, 1], [], []>} : vector<4x512xf32>, vector<512x128xf32>, vector<4x128xf32> -> vector<4x128xf32>
    %41 = vector.extract_strided_slice %40 {offsets = [0, 0], sizes = [4, 4], strides = [1, 1]} : vector<4x128xf32> to vector<4x4xf32>
    %42 = vector.extract_strided_slice %40 {offsets = [0, 4], sizes = [4, 4], strides = [1, 1]} : vector<4x128xf32> to vector<4x4xf32>
    %43 = tpu.reciprocal %41 {approx = true} : vector<4x4xf32> -> vector<4x4xf32>
    %44 = arith.mulf %42, %43 : vector<4x4xf32>
    %c0_18 = arith.constant 0 : index
    %c0_19 = arith.constant 0 : index
    %45 = vector.load %arg7[%c0_18, %c0_19] : memref<4x4xf32, #tpu.memory_space<vmem>>, vector<4x4xf32>
    tpu.vector_store %arg7[%c0_18, %c0_19], %44 {strides = array<i32>} : memref<4x4xf32, #tpu.memory_space<vmem>>, vector<4x4xf32>,
    return
  }
  func.func @transform_0(%arg0: i32) -> (i32, i32) {
    %c0_i32 = arith.constant 0 : i32
    %c0_i32_0 = arith.constant 0 : i32
    return %arg0, %c0_i32 : i32, i32
  }
  func.func @transform_1(%arg0: i32) -> (i32, i32) {
    %c0_i32 = arith.constant 0 : i32
    %c0_i32_0 = arith.constant 0 : i32
    %c0_i32_1 = arith.constant 0 : i32
    return %c0_i32, %c0_i32_0 : i32, i32
  }
  func.func @transform_2(%arg0: i32) -> (i32, i32) {
    %c0_i32 = arith.constant 0 : i32
    %c0_i32_0 = arith.constant 0 : i32
    %c0_i32_1 = arith.constant 0 : i32
    return %c0_i32, %c0_i32_0 : i32, i32
  }
  func.func @transform_3(%arg0: i32) -> (i32, i32) {
    %c0_i32 = arith.constant 0 : i32
    %c0_i32_0 = arith.constant 0 : i32
    %c0_i32_1 = arith.constant 0 : i32
    return %c0_i32, %c0_i32_0 : i32, i32
  }
  func.func @transform_4(%arg0: i32) -> (i32, i32) {
    %c0_i32 = arith.constant 0 : i32
    %c0_i32_0 = arith.constant 0 : i32
    %c0_i32_1 = arith.constant 0 : i32
    return %c0_i32, %c0_i32_0 : i32, i32
  }
  func.func @transform_5(%arg0: i32) -> (i32, i32) {
    %c0_i32 = arith.constant 0 : i32
    %c0_i32_0 = arith.constant 0 : i32
    %c0_i32_1 = arith.constant 0 : i32
    return %c0_i32, %c0_i32_0 : i32, i32
  }
  func.func @transform_6(%arg0: i32) -> (i32, i32) {
    %c0_i32 = arith.constant 0 : i32
    %c0_i32_0 = arith.constant 0 : i32
    return %arg0, %c0_i32 : i32, i32
  }
}

module attributes {stable_mosaic.version = 11 : i64} {
  func.func @_categorical_kernel(%arg0: i32, %arg1: memref<4x16xbf16, #tpu.memory_space<vmem>>, %arg2: memref<16x32xbf16, #tpu.memory_space<vmem>>, %arg3: memref<1x32xf32, #tpu.memory_space<vmem>>, %arg4: memref<32x512xbf16, #tpu.memory_space<vmem>>, %arg5: memref<1x512xf32, #tpu.memory_space<vmem>>, %arg6: memref<512x128xf32, #tpu.memory_space<vmem>>, %arg7: memref<4x4xf32, #tpu.memory_space<vmem>>) attributes {dimension_semantics = [#tpu.dimension_semantics<parallel>], iteration_bounds = array<i64: 1>, scalar_prefetch = 0 : i64, scratch_operands = 0 : i64, tpu.core_type = #tpu.core_type<tc>, window_params = [{transform_indices = @transform_0, window_bounds = array<i64: 4, 16>}, {pipeline_mode = #tpu.pipeline_mode<synchronous>, transform_indices = @transform_1, window_bounds = array<i64: 16, 32>}, {pipeline_mode = #tpu.pipeline_mode<synchronous>, transform_indices = @transform_2, window_bounds = array<i64: 1, 32>}, {pipeline_mode = #tpu.pipeline_mode<synchronous>, transform_indices = @transform_3, window_bounds = array<i64: 32, 512>}, {pipeline_mode = #tpu.pipeline_mode<synchronous>, transform_indices = @transform_4, window_bounds = array<i64: 1, 512>}, {pipeline_mode = #tpu.pipeline_mode<synchronous>, transform_indices = @transform_5, window_bounds = array<i64: 512, 128>}, {transform_indices = @transform_6, window_bounds = array<i64: 4, 4>}]} {
    %c0 = arith.constant 0 : index
    %c0_0 = arith.constant 0 : index
    %0 = vector.load %arg1[%c0, %c0_0] : memref<4x16xbf16, #tpu.memory_space<vmem>>, vector<4x16xbf16>
    %c0_1 = arith.constant 0 : index
    %c0_2 = arith.constant 0 : index
    %1 = vector.load %arg2[%c0_1, %c0_2] : memref<16x32xbf16, #tpu.memory_space<vmem>>, vector<16x32xbf16>
    %cst = arith.constant dense<0.000000e+00> : vector<4x32xf32>
    %2 = tpu.matmul %0, %1, %cst {dimension_numbers = #tpu.dot_dimension_numbers<[1], [0], [0], [1], [0, 0, 1, 1], [], []>} : vector<4x16xbf16>, vector<16x32xbf16>, vector<4x32xf32> -> vector<4x32xf32>
    %c0_3 = arith.constant 0 : index
    %c0_4 = arith.constant 0 : index
    %3 = vector.load %arg3[%c0_3, %c0_4] : memref<1x32xf32, #tpu.memory_space<vmem>>, vector<1x32xf32>
    %4 = vector.broadcast %3 : vector<1x32xf32> to vector<4x32xf32>
    %5 = arith.addf %2, %4 : vector<4x32xf32>
    %cst_5 = arith.constant 0.000000e+00 : f32
    %6 = vector.broadcast %cst_5 : f32 to vector<4x32xf32>
    %7 = arith.maximumf %5, %6 : vector<4x32xf32>
    %8 = arith.truncf %7 : vector<4x32xf32> to vector<4x32xbf16>
    %c0_6 = arith.constant 0 : index
    %c0_7 = arith.constant 0 : index
    %9 = vector.load %arg4[%c0_6, %c0_7] : memref<32x512xbf16, #tpu.memory_space<vmem>>, vector<32x512xbf16>
    %cst_8 = arith.constant dense<0.000000e+00> : vector<4x512xf32>
    %10 = tpu.matmul %8, %9, %cst_8 {dimension_numbers = #tpu.dot_dimension_numbers<[1], [0], [0], [1], [0, 0, 1, 1], [], []>} : vector<4x32xbf16>, vector<32x512xbf16>, vector<4x512xf32> -> vector<4x512xf32>
    %c0_9 = arith.constant 0 : index
    %c0_10 = arith.constant 0 : index
    %11 = vector.load %arg5[%c0_9, %c0_10] : memref<1x512xf32, #tpu.memory_space<vmem>>, vector<1x512xf32>
    %12 = vector.broadcast %11 : vector<1x512xf32> to vector<4x512xf32>
    %13 = arith.addf %10, %12 : vector<4x512xf32>
    %14 = vector.extract_strided_slice %13 {offsets = [0, 0], sizes = [4, 128], strides = [1, 1]} : vector<4x512xf32> to vector<4x128xf32>
    %cst_11 = arith.constant dense<0xFF800000> : vector<4xf32>
    %15 = vector.multi_reduction <maximumf>, %14, %cst_11 [1] : vector<4x128xf32> to vector<4xf32>
    %16 = vector.shape_cast %15 : vector<4xf32> to vector<4x1xf32>
    %17 = vector.broadcast %16 : vector<4x1xf32> to vector<4x128xf32>
    %18 = arith.subf %14, %17 : vector<4x128xf32>
    %19 = math.exp %18 : vector<4x128xf32>
    %20 = vector.extract_strided_slice %13 {offsets = [0, 128], sizes = [4, 128], strides = [1, 1]} : vector<4x512xf32> to vector<4x128xf32>
    %cst_12 = arith.constant dense<0xFF800000> : vector<4xf32>
    %21 = vector.multi_reduction <maximumf>, %20, %cst_12 [1] : vector<4x128xf32> to vector<4xf32>
    %22 = vector.shape_cast %21 : vector<4xf32> to vector<4x1xf32>
    %23 = vector.broadcast %22 : vector<4x1xf32> to vector<4x128xf32>
    %24 = arith.subf %20, %23 : vector<4x128xf32>
    %25 = math.exp %24 : vector<4x128xf32>
    %26 = vector.extract_strided_slice %13 {offsets = [0, 256], sizes = [4, 128], strides = [1, 1]} : vector<4x512xf32> to vector<4x128xf32>
    %cst_13 = arith.constant dense<0xFF800000> : vector<4xf32>
    %27 = vector.multi_reduction <maximumf>, %26, %cst_13 [1] : vector<4x128xf32> to vector<4xf32>
    %28 = vector.shape_cast %27 : vector<4xf32> to vector<4x1xf32>
    %29 = vector.broadcast %28 : vector<4x1xf32> to vector<4x128xf32>
    %30 = arith.subf %26, %29 : vector<4x128xf32>
    %31 = math.exp %30 : vector<4x128xf32>
    %32 = vector.extract_strided_slice %13 {offsets = [0, 384], sizes = [4, 128], strides = [1, 1]} : vector<4x512xf32> to vector<4x128xf32>
    %cst_14 = arith.constant dense<0xFF800000> : vector<4xf32>
    %33 = vector.multi_reduction <maximumf>, %32, %cst_14 [1] : vector<4x128xf32> to vector<4xf32>
    %34 = vector.shape_cast %33 : vector<4xf32> to vector<4x1xf32>
    %35 = vector.broadcast %34 : vector<4x1xf32> to vector<4x128xf32>
    %36 = arith.subf %32, %35 : vector<4x128xf32>
    %37 = math.exp %36 : vector<4x128xf32>
    %38 = tpu.concatenate %19, %25, %31, %37 in 1 : vector<4x128xf32>, vector<4x128xf32>, vector<4x128xf32>, vector<4x128xf32> -> vector<4x512xf32>
    %c0_15 = arith.constant 0 : index
    %c0_16 = arith.constant 0 : index
    %39 = vector.load %arg6[%c0_15, %c0_16] : memref<512x128xf32, #tpu.memory_space<vmem>>, vector<512x128xf32>
    %cst_17 = arith.constant dense<0.000000e+00> : vector<4x128xf32>
    %40 = tpu.matmul %38, %39, %cst_17 {dimension_numbers = #tpu.dot_dimension_numbers<[1], [0], [0], [1], [0, 0, 1, 1], [], []>} : vector<4x512xf32>, vector<512x128xf32>, vector<4x128xf32> -> vector<4x128xf32>
    %41 = vector.extract_strided_slice %40 {offsets = [0, 0], sizes = [4, 4], strides = [1, 1]} : vector<4x128xf32> to vector<4x4xf32>
    %42 = vector.extract_strided_slice %40 {offsets = [0, 4], sizes = [4, 4], strides = [1, 1]} : vector<4x128xf32> to vector<4x4xf32>
    %43 = tpu.reciprocal %41 {approx = true} : vector<4x4xf32> -> vector<4x4xf32>
    %44 = arith.mulf %42, %43 : vector<4x4xf32>
    %c0_18 = arith.constant 0 : index
    %c0_19 = arith.constant 0 : index
    %45 = vector.load %arg7[%c0_18, %c0_19] : memref<4x4xf32, #tpu.memory_space<vmem>>, vector<4x4xf32>
    tpu.vector_store %arg7[%c0_18, %c0_19], %44 {strides = array<i32>} : memref<4x4xf32, #tpu.memory_space<vmem>>, vector<4x4xf32>,
    return
  }
  func.func @transform_0(%arg0: i32) -> (i32, i32) {
    %c0_i32 = arith.constant 0 : i32
    %c0_i32_0 = arith.constant 0 : i32
    return %arg0, %c0_i32 : i32, i32
  }
  func.func @transform_1(%arg0: i32) -> (i32, i32) {
    %c0_i32 = arith.constant 0 : i32
    %c0_i32_0 = arith.constant 0 : i32
    %c0_i32_1 = arith.constant 0 : i32
    return %c0_i32, %c0_i32_0 : i32, i32
  }
  func.func @transform_2(%arg0: i32) -> (i32, i32) {
    %c0_i32 = arith.constant 0 : i32
    %c0_i32_0 = arith.constant 0 : i32
    %c0_i32_1 = arith.constant 0 : i32
    return %c0_i32, %c0_i32_0 : i32, i32
  }
  func.func @transform_3(%arg0: i32) -> (i32, i32) {
    %c0_i32 = arith.constant 0 : i32
    %c0_i32_0 = arith.constant 0 : i32
    %c0_i32_1 = arith.constant 0 : i32
    return %c0_i32, %c0_i32_0 : i32, i32
  }
  func.func @transform_4(%arg0: i32) -> (i32, i32) {
    %c0_i32 = arith.constant 0 : i32
    %c0_i32_0 = arith.constant 0 : i32
    %c0_i32_1 = arith.constant 0 : i32
    return %c0_i32, %c0_i32_0 : i32, i32
  }
  func.func @transform_5(%arg0: i32) -> (i32, i32) {
    %c0_i32 = arith.constant 0 : i32
    %c0_i32_0 = arith.constant 0 : i32
    %c0_i32_1 = arith.constant 0 : i32
    return %c0_i32, %c0_i32_0 : i32, i32
  }
  func.func @transform_6(%arg0: i32) -> (i32, i32) {
    %c0_i32 = arith.constant 0 : i32
    %c0_i32_0 = arith.constant 0 : i32
    return %arg0, %c0_i32 : i32, i32
  }
}

</mosaic_0001>

<bundles_post_ra>
// kernel: tpu_custom_call.1
= control target key start
LH: loop header
LB: loop body
LE: loop exit
PB: predicated region body
PF: predicated region fallthrough
CT: control target
= control target key end

     0   :  { %11 = vsyncpa [#allocation3], 0  ;;  %s884_s0 = inlined_call_operand.hbm [shape: bf16[4,16], index: 0, kind: input, shape index: {}]   ;;  %s885_s1 = inlined_call_operand.hbm [shape: bf16[16,32], index: 1, kind: input, shape index: {}]   ;;  %s886_s2 = inlined_call_operand.vmem [shape: f32[1,32], index: 2, kind: input, shape index: {}]   ;;  %s887_s3 = inlined_call_operand.hbm [shape: bf16[32,512], index: 3, kind: input, shape index: {}]   ;;  %s888_s4 = inlined_call_operand.vmem [shape: f32[1,512], index: 4, kind: input, shape index: {}]   ;;  %s889_s5 = inlined_call_operand.hbm [shape: f32[512,128], index: 5, kind: input, shape index: {}]   ;;  %s890_s6 = inlined_call_operand.hbm [shape: f32[4,4], index: 6, kind: output, shape index: {}]  }
   0x1   :  { %12 = vsyncpa [#allocation6], 0 }
   0x2   :  { %13 = vsyncpa [#allocation9], 0 }
   0x3   :  { %14 = vsyncpa [#allocation4], 0  ;;  %s791_s21 = smov [#allocation5]  }
   0x4   :  { %s30_s22 = sshll.u32 %s791_s21, 4  ;;  %s31_s22 = int_to_ptr.vmem [resolvable:$true] %s30_s22 }
   0x5   :  { %s691_s23 = scalar_lea.vmem %s31_s22, 128  ;;  %p696_p1 = scmp.lt.s32.totalorder %s31_s22, %s31_s22 }
   0x6   :  { %p692_p0 = scmp.ne.s32.totalorder %s31_s22, %s691_s23  ;;  %p697_p2 = scmp.lt.s32.totalorder %s691_s23, %s691_s23 }
   0x8   :  { %p698_p3 = por %p697_p2, %p696_p1 }
   0xa   :  { %p699_p4 = pnand %p698_p3, %p692_p0 }
   0xc   :  { %702 = shalt.err (!%p699_p4)
}
   0xd   :  { %s792_s24 = smov 64   ;;  %s793_s25 = smov 4  }
   0xe   :  { %36 = dma.hbm_to_vmem [thread:$0]  %s885_s1, 128, %s31_s22, [#allocation6], %s792_s24, %s792_s24, %s793_s25  }
   0xf   :  { %s794_s28 = smov [#allocation2]   ;;  %s795_s30 = smov [#allocation7]  }
  0x10   :  { %s21_s29 = sshll.u32 %s794_s28, 4  ;;  %s44_s7 = sshll.u32 %s795_s30, 4  ;;  %s22_s29 = int_to_ptr.vmem [resolvable:$true] %s21_s29  ;;  %s45_s7 = int_to_ptr.vmem [resolvable:$true] %s44_s7 }
  0x11   :  { %s711_s8 = scalar_lea.vmem %s22_s29, 32  ;;  %p716_p6 = scmp.lt.s32.totalorder %s22_s29, %s22_s29 }
  0x12   :  { %p712_p5 = scmp.ne.s32.totalorder %s22_s29, %s711_s8  ;;  %p717_p7 = scmp.lt.s32.totalorder %s711_s8, %s711_s8 }
  0x14   :  { %p718_p8 = por %p717_p7, %p716_p6 }
  0x16   :  { %p719_p9 = pnand %p718_p8, %p712_p5 }
  0x18   :  { %722 = shalt.err (!%p719_p9)
}
  0x19   :  { %24 = dma.hbm_to_vmem [thread:$0]  %s884_s0, 32, %s22_s29, [#allocation3]  }
  0x1a   :  { %s731_s11 = scalar_lea.vmem %s45_s7, 1024  ;;  %p736_p11 = scmp.lt.s32.totalorder %s45_s7, %s45_s7 }
  0x1b   :  { %p732_p10 = scmp.ne.s32.totalorder %s45_s7, %s731_s11  ;;  %p737_p12 = scmp.lt.s32.totalorder %s731_s11, %s731_s11 }
  0x1d   :  { %p738_p13 = por %p737_p12, %p736_p11 }
  0x1f   :  { %p739_p0 = pnand %p738_p13, %p732_p10 }
  0x21   :  { %742 = shalt.err (!%p739_p0)
}
  0x22   :  { %s796_s1 = smov 256   ;;  %s797_s12 = smov 16  }
  0x23   :  { %50 = dma.hbm_to_vmem [thread:$0]  %s887_s3, 1024, %s45_s7, [#allocation6], %s796_s1, %s796_s1, %s797_s12  }
  0x24   :  { %s798_s15 = smov [#allocation8]  }
  0x25   :  { %s58_s16 = sshll.u32 %s798_s15, 4  ;;  %s59_s16 = int_to_ptr.vmem [resolvable:$true] %s58_s16 }
  0x26   :  { %s751_s17 = scalar_lea.vmem %s59_s16, 8192  ;;  %p756_p2 = scmp.lt.s32.totalorder %s59_s16, %s59_s16 }
  0x27   :  { %p752_p1 = scmp.ne.s32.totalorder %s59_s16, %s751_s17  ;;  %p757_p3 = scmp.lt.s32.totalorder %s751_s17, %s751_s17 }
  0x29   :  { %p758_p4 = por %p757_p3, %p756_p2 }
  0x2b   :  { %p759_p5 = pnand %p758_p4, %p752_p1 }
  0x2d   :  { %762 = shalt.err (!%p759_p5)
}
  0x2e   :  { %s799_s0 = smov 128   ;;  %s800_s18 = smov 8  }
  0x2f   :  { %64 = dma.hbm_to_vmem [thread:$0]  %s889_s5, 8192, %s59_s16, [#allocation9], %s799_s0, %s799_s0, %s800_s18  }
  0x30   :  { %783 = dma.done.wait [#allocation3], 32  }
  0x31   :  { %784 = vsyncadd [#allocation3], 4294967264 }
  0x32   :  { %785 = dma.done.wait [#allocation6], 1152  }
  0x33   :  { %786 = vsyncadd [#allocation6], 4294966144 }
  0x34   :  { %787 = dma.done.wait [#allocation9], 8192  }
  0x35   :  { %788 = vsyncadd [#allocation9], 4294959104  ;;  %v801_v0 = vmov 0.0   ;;  %vm802_vm0 = vmmov 0   ;;  %v660_v1 = vld [vmem:[#allocation5] sm:$0xff]   ;;  %vm94_vm1 = vcmask 130048   ;;  %v150_v38 = vlaneseq }
  0x36   :  { %639 = vmatprep.subr.bf16.mxu0 %v801_v0  ;;  %641 = vmatprep.mubr.msk.bf16.mxu0 %vm802_vm0, %v801_v0  ;;  %v78_v2 = vld [vmem:[#allocation2] sm:$0x3]  ;;  %v663_v4 = vld [vmem:[#allocation7 + $0x28] ss:$16 sps:$4 sm:$0xff]   ;;  %v665_v5 = vld [vmem:[#allocation7 + $0x2c] ss:$16 sps:$4 sm:$0xff]  }
  0x37   :  { %640 = vmatpush3.bf16.msra.mxu0 %v660_v1  ;;  %v661_v3 = vld [vmem:[#allocation7 + $0x24] ss:$16 sps:$4 sm:$0xff]   ;;  %v666_v6 = vld [vmem:[#allocation7 + $0x20] ss:$16 sps:$4 sm:$0xff]   ;;  %v671_v8 = vld [vmem:[#allocation7 + $0xc] ss:$16 sps:$4 sm:$0xff]  }
  0x38   :  { %226 = vmatprep.subr.bf16.mxu1 %v661_v3  ;;  %267 = vmatprep.subr.bf16.mxu0 %v665_v5  ;;  %v667_v7 = vld [vmem:[#allocation7 + $0x4] ss:$16 sps:$4 sm:$0xff]   ;;  %v669_v9 = vld [vmem:[#allocation7 + $0x8] ss:$16 sps:$4 sm:$0xff]   ;;  %v672_v10 = vld [vmem:[#allocation7] ss:$16 sps:$4 sm:$0xff]  }
  0x39   :  { %227 = vmatpush1.bf16.msra.mxu1 %v666_v6  ;;  %v803_v11 = vmov 0   ;;  %v554_v12 = vld [vmem:[%s886_s2] ss:$0 sm:$0xff]  ;;  %vm210_vm2 = vcmask 261120   ;;  %v352_v20 = vld [vmem:[#allocation8 + $0xf8] sm:$0xff]  ;;  %v351_v22 = vld [vmem:[#allocation8 + $0xf0] sm:$0xff] }
  0x3a   :  { %642 = vmatmul.mubr.msk.bf16.vlgmr.msra.gmra.mxu0 %vm94_vm1, %v78_v2  ;;  %228 = vmatprep.subr.bf16.mxu1 %v667_v7  ;;  %v336_v21 = vld [vmem:[#allocation8 + $0x78] sm:$0xff]  ;;  %v335_v23 = vld [vmem:[#allocation8 + $0x70] sm:$0xff]  ;;  %v350_v25 = vld [vmem:[#allocation8 + $0xe8] sm:$0xff]  ;;  %v151_v39 = vshrl.u32 %v150_v38, 7  ;;  %vm296_vm3 = vcmask 1043456   ;;  %s805_s22 = smov [#allocation10]  }
  0x3b   :  { %268 = vmatpush1.bf16.msra.mxu0 %v663_v4  ;;  %246 = vmatprep.mubr.bf16.mxu1 %v803_v11  ;;  %v384_v24 = vld [vmem:[#allocation8 + $0x1f8] sm:$0xff]  ;;  %v334_v27 = vld [vmem:[#allocation8 + $0x68] sm:$0xff]  ;;  %v383_v28 = vld [vmem:[#allocation8 + $0x1f0] sm:$0xff]  ;;  %s543_s23 = sshll.u32 %s805_s22, 4  ;;  %vm535_vm4 = vcmask 27648   ;;  %s544_s23 = int_to_ptr.vmem [resolvable:$true] %s543_s23 }
  0x3c   :  { %269 = vmatprep.subr.bf16.mxu0 %v671_v8  ;;  %287 = vmatprep.mubr.bf16.mxu0 %v803_v11  ;;  %v368_v26 = vld [vmem:[#allocation8 + $0x178] sm:$0xff]  ;;  %v367_v29 = vld [vmem:[#allocation8 + $0x170] sm:$0xff]  ;;  %v349_v30 = vld [vmem:[#allocation8 + $0xe0] sm:$0xff]  ;;  %v152_v40 = vsub.s32 0, %v151_v39  ;;  %v160_v42 = vsub.s32 2, %v151_v39  ;;  %v156_v43 = vsub.s32 1, %v151_v39  ;;  %p768_p7 = scmp.lt.s32.totalorder %s544_s23, %s544_s23 }
  0x3d   :  { %229 = vmatpush1.bf16.msra.mxu1 %v672_v10  ;;  %v382_v31 = vld [vmem:[#allocation8 + $0x1e8] sm:$0xff]  ;;  %v333_v32 = vld [vmem:[#allocation8 + $0x60] sm:$0xff]  ;;  %v348_v35 = vld [vmem:[#allocation8 + $0xd8] sm:$0xff]  ;;  %v164_v45 = vsub.s32 3, %v151_v39  ;;  %s763_s24 = scalar_lea.vmem %s544_s23, 64 }
  0x3e   :  { %569 = vmatprep.subr.mxu1 %v352_v20  ;;  %v366_v33 = vld [vmem:[#allocation8 + $0x168] sm:$0xff]  ;;  %v381_v34 = vld [vmem:[#allocation8 + $0x1e0] sm:$0xff]  ;;  %v332_v36 = vld [vmem:[#allocation8 + $0x58] sm:$0xff]  ;;  %p764_p6 = scmp.ne.s32.totalorder %s544_s23, %s763_s24  ;;  %p769_p8 = scmp.lt.s32.totalorder %s763_s24, %s763_s24 }
  0x3f   :  { %270 = vmatpush1.bf16.msra.mxu0 %v669_v9  ;;  %v347_v37 = vld [vmem:[#allocation8 + $0xd0] sm:$0xff]  ;;  %v365_v2 = vld [vmem:[#allocation8 + $0x160] sm:$0xff]  ;;  %v346_v3 = vld [vmem:[#allocation8 + $0xc8] sm:$0xff] }
  0x40   :  { %604 = vmatprep.subr.mxu0 %v384_v24  ;;  %v148_v41 = vld [vmem:[%s888_s4] sm:$0xf]  ;;  %v380_v4 = vld [vmem:[#allocation8 + $0x1d8] sm:$0xff]  ;;  %v345_v7 = vld [vmem:[#allocation8 + $0xc0] sm:$0xff]  ;;  %s804_s4 = smov 124   ;;  %p770_p9 = por %p769_p8, %p768_p7 }
  0x41   :  { %v153_v44 = vrot.slane %v148_v41, %v152_v40  ;;  %v161_v46 = vrot.slane %v148_v41, %v160_v42  ;;  %v157_v47 = vrot.slane %v148_v41, %v156_v43  ;;  %v165_v51 = vrot.slane %v148_v41, %v164_v45  ;;  %v331_v1 = vld [vmem:[#allocation8 + $0x50] sm:$0xff]  ;;  %v330_v5 = vld [vmem:[#allocation8 + $0x48] sm:$0xff]  ;;  %v364_v6 = vld [vmem:[#allocation8 + $0x158] sm:$0xff] }
  0x42   :  { %v379_v8 = vld [vmem:[#allocation8 + $0x1d0] sm:$0xff]  ;;  %v329_v9 = vld [vmem:[#allocation8 + $0x40] sm:$0xff]  ;;  %v344_v11 = vld [vmem:[#allocation8 + $0xb8] sm:$0xff]  ;;  %p771_p10 = pnand %p770_p9, %p764_p6 }
  0x43   :  { %v363_v10 = vld [vmem:[#allocation8 + $0x150] sm:$0xff]  ;;  %v376_v20 = vld [vmem:[#allocation8 + $0x1b8] sm:$0xff]  ;;  %v337_v39 = vld [vmem:[#allocation8 + $0x80] sm:$0xff] }
  0x44   :  { %v375_v24 = vld [vmem:[#allocation8 + $0x1b0] sm:$0xff]  ;;  %v356_v38 = vld [vmem:[#allocation8 + $0x118] sm:$0xff]  ;;  %v321_v41 = vld [vmem:[#allocation8] sm:$0xff] }
  0x45   :  { %v371_v40 = vld [vmem:[#allocation8 + $0x190] sm:$0xff]  ;;  %v370_v43 = vld [vmem:[#allocation8 + $0x188] sm:$0xff]  ;;  %v369_v45 = vld [vmem:[#allocation8 + $0x180] sm:$0xff] }
  0x46   :  { %v355_v42 = vld [vmem:[#allocation8 + $0x110] sm:$0xff] }
  0xfa   :  { %v132_v13 = vpop.f32.mrf.mxu0 }
  0xfb   :  { %v133_v14 = vadd.f32 %v554_v12, %v132_v13  ;;  %v378_v12 = vld [vmem:[#allocation8 + $0x1c8] sm:$0xff]  ;;  %v328_v13 = vld [vmem:[#allocation8 + $0x38] sm:$0xff] }
  0xfc   :  { %v643_v15 = vpop.f32.mrf.mxu0 }
  0xfd   :  { %v138_v16 = vmax.f32 %v133_v14, 0.0  ;;  %v362_v14 = vld [vmem:[#allocation8 + $0x148] sm:$0xff]  ;;  %v343_v15 = vld [vmem:[#allocation8 + $0xb0] sm:$0xff] }
  0xfe   :  { %v135_v17 = vpop.f32.mrf.mxu0 }
  0xff   :  { %v139_v18 = vpack.c.bf16 %v138_v16, %v138_v16  ;;  %v377_v16 = vld [vmem:[#allocation8 + $0x1c0] sm:$0xff]  ;;  %v327_v17 = vld [vmem:[#allocation8 + $0x30] sm:$0xff] }
 0x100   :  { %v644_v19 = vpop.f32.mrf.mxu0 }
 0x101   :  { %565 = vmatmul.mubr.msk.bf16.vlgmr.msra.gmra.mxu1 %vm210_vm2, %v139_v18  ;;  %566 = vmatmul.mubr.msk.bf16.vlgmr.msra.gmra.mxu0 %vm210_vm2, %v139_v18  ;;  %v361_v18 = vld [vmem:[#allocation8 + $0x140] sm:$0xff]  ;;  %v342_v19 = vld [vmem:[#allocation8 + $0xa8] sm:$0xff] }
 0x102   :  { %570 = vmatpush3.msra.mxu1 %v336_v21  ;;  %605 = vmatpush3.msra.mxu0 %v368_v26  ;;  %v326_v21 = vld [vmem:[#allocation8 + $0x28] sm:$0xff]  ;;  %v359_v26 = vld [vmem:[#allocation8 + $0x130] sm:$0xff] }
 0x103   :  { %571 = vmatprep.subr.mxu1 %v351_v22  ;;  %606 = vmatprep.subr.mxu0 %v383_v28  ;;  %v360_v22 = vld [vmem:[#allocation8 + $0x138] sm:$0xff]  ;;  %v374_v28 = vld [vmem:[#allocation8 + $0x1a8] sm:$0xff] }
 0x104   :  { %572 = vmatpush3.msra.mxu1 %v335_v23  ;;  %607 = vmatpush3.msra.mxu0 %v367_v29  ;;  %v341_v23 = vld [vmem:[#allocation8 + $0xa0] sm:$0xff]  ;;  %v324_v29 = vld [vmem:[#allocation8 + $0x18] sm:$0xff] }
 0x105   :  { %573 = vmatprep.subr.mxu1 %v350_v25  ;;  %608 = vmatprep.subr.mxu0 %v382_v31  ;;  %v325_v25 = vld [vmem:[#allocation8 + $0x20] sm:$0xff]  ;;  %v339_v31 = vld [vmem:[#allocation8 + $0x90] sm:$0xff] }
 0x106   :  { %574 = vmatpush3.msra.mxu1 %v334_v27  ;;  %609 = vmatpush3.msra.mxu0 %v366_v33  ;;  %v340_v27 = vld [vmem:[#allocation8 + $0x98] sm:$0xff]  ;;  %v323_v33 = vld [vmem:[#allocation8 + $0x10] sm:$0xff] }
 0x107   :  { %575 = vmatprep.subr.mxu1 %v349_v30  ;;  %610 = vmatprep.subr.mxu0 %v381_v34  ;;  %v358_v30 = vld [vmem:[#allocation8 + $0x128] sm:$0xff]  ;;  %v357_v34 = vld [vmem:[#allocation8 + $0x120] sm:$0xff] }
 0x108   :  { %576 = vmatpush3.msra.mxu1 %v333_v32  ;;  %611 = vmatpush3.msra.mxu0 %v365_v2  ;;  %v373_v32 = vld [vmem:[#allocation8 + $0x1a0] sm:$0xff] }
 0x109   :  { %577 = vmatprep.subr.mxu1 %v348_v35  ;;  %612 = vmatprep.subr.mxu0 %v380_v4  ;;  %v338_v35 = vld [vmem:[#allocation8 + $0x88] sm:$0xff] }
 0x10a   :  { %578 = vmatpush3.msra.mxu1 %v332_v36  ;;  %613 = vmatpush3.msra.mxu0 %v364_v6  ;;  %v372_v36 = vld [vmem:[#allocation8 + $0x198] sm:$0xff] }
 0x10b   :  { %579 = vmatprep.subr.mxu1 %v347_v37  ;;  %614 = vmatprep.subr.mxu0 %v379_v8  ;;  %v322_v37 = vld [vmem:[#allocation8 + $0x8] sm:$0xff] }
 0x10c   :  { %580 = vmatpush3.msra.mxu1 %v331_v1  ;;  %615 = vmatpush3.msra.mxu0 %v363_v10 }
 0x10d   :  { %581 = vmatprep.subr.mxu1 %v346_v3  ;;  %616 = vmatprep.subr.mxu0 %v378_v12 }
 0x10e   :  { %582 = vmatpush3.msra.mxu1 %v330_v5  ;;  %617 = vmatpush3.msra.mxu0 %v362_v14 }
 0x10f   :  { %583 = vmatprep.subr.mxu1 %v345_v7  ;;  %618 = vmatprep.subr.mxu0 %v377_v16 }
 0x110   :  { %584 = vmatpush3.msra.mxu1 %v329_v9  ;;  %619 = vmatpush3.msra.mxu0 %v361_v18 }
 0x111   :  { %585 = vmatprep.subr.mxu1 %v344_v11  ;;  %620 = vmatprep.subr.mxu0 %v376_v20 }
 0x112   :  { %586 = vmatpush3.msra.mxu1 %v328_v13  ;;  %621 = vmatpush3.msra.mxu0 %v360_v22 }
 0x113   :  { %587 = vmatprep.subr.mxu1 %v343_v15  ;;  %622 = vmatprep.subr.mxu0 %v375_v24 }
 0x114   :  { %588 = vmatpush3.msra.mxu1 %v327_v17  ;;  %623 = vmatpush3.msra.mxu0 %v359_v26 }
 0x115   :  { %589 = vmatprep.subr.mxu1 %v342_v19  ;;  %624 = vmatprep.subr.mxu0 %v374_v28 }
 0x116   :  { %590 = vmatpush3.msra.mxu1 %v326_v21  ;;  %625 = vmatpush3.msra.mxu0 %v358_v30 }
 0x117   :  { %591 = vmatprep.subr.mxu1 %v341_v23  ;;  %626 = vmatprep.subr.mxu0 %v373_v32 }
 0x118   :  { %592 = vmatpush3.msra.mxu1 %v325_v25  ;;  %627 = vmatpush3.msra.mxu0 %v357_v34 }
 0x119   :  { %593 = vmatprep.subr.mxu1 %v340_v27  ;;  %628 = vmatprep.subr.mxu0 %v372_v36 }
 0x11a   :  { %594 = vmatpush3.msra.mxu1 %v324_v29  ;;  %629 = vmatpush3.msra.mxu0 %v356_v38 }
 0x11b   :  { %595 = vmatprep.subr.mxu1 %v339_v31  ;;  %630 = vmatprep.subr.mxu0 %v371_v40 }
 0x11c   :  { %596 = vmatpush3.msra.mxu1 %v323_v33  ;;  %631 = vmatpush3.msra.mxu0 %v355_v42 }
 0x11d   :  { %597 = vmatprep.subr.mxu1 %v338_v35  ;;  %632 = vmatprep.subr.mxu0 %v370_v43 }
 0x11e   :  { %598 = vmatpush3.msra.mxu1 %v322_v37 }
 0x11f   :  { %599 = vmatprep.subr.mxu1 %v337_v39 }
 0x120   :  { %600 = vmatpush3.msra.mxu1 %v321_v41 }
 0x1c1   :  { %v248_v48 = vpop.f32.mrf.mxu1  ;;  %v289_v49 = vpop.f32.mrf.mxu0 }
 0x1c2   :  { %v860_v50 = vadd.f32 %v248_v48, %v153_v44  ;;  %v862_v54 = vadd.f32 %v289_v49, %v161_v46  ;;  %v354_v44 = vld [vmem:[#allocation8 + $0x108] sm:$0xff]  ;;  %v353_v46 = vld [vmem:[#allocation8 + $0x100] sm:$0xff] }
 0x1c3   :  { %v250_v52 = vpop.f32.mrf.mxu1  ;;  %v291_v53 = vpop.f32.mrf.mxu0  ;;  %633 = vmatpush3.msra.mxu0 %v354_v44 }
 0x1c4   :  { %v864_v55 = vadd.f32 %v250_v52, %v157_v47  ;;  %v297_v56 = vsel %vm296_vm3, %v860_v50, -inf  ;;  %v868_v59 = vadd.f32 %v291_v53, %v165_v51  ;;  %v309_v63 = vsel %vm296_vm3, %v862_v54, -inf  ;;  %634 = vmatprep.subr.mxu0 %v369_v45 }
 0x1c5   :  { %v252_v57 = vpop.f32.mrf.mxu1  ;;  %298 = vmax.xlane.f32.xlu1 %v297_v56  ;;  %v293_v58 = vpop.f32.mrf.mxu0  ;;  %635 = vmatpush3.msra.mxu0 %v353_v46 }
 0x1c6   :  { %v303_v60 = vsel %vm296_vm3, %v864_v55, -inf  ;;  %v315_v0 = vsel %vm296_vm3, %v868_v59, -inf }
 0x1c7   :  { %v253_v61 = vpop.f32.mrf.mxu1  ;;  %304 = vmax.xlane.f32.xlu0 %v303_v60  ;;  %v294_v62 = vpop.f32.mrf.mxu0 }
 0x1c9   :  { %310 = vmax.xlane.f32.xlu1 %v309_v63 }
 0x1cb   :  { %316 = vmax.xlane.f32.xlu0 %v315_v0 }
 0x24e   :  { %v299_v47 = vpop.xlane.xlu1 %298 }
 0x24f   :  { %v300_v48 = vsub.f32 %v860_v50, %v299_v47 }
 0x250   :  { %v305_v49 = vpop.xlane.xlu0 %304 }
 0x251   :  { %v306_v51 = vsub.f32 %v864_v55, %v305_v49  ;;  %v301_v52 = vmul.f32 1.442695, %v300_v48 }
 0x252   :  { %v311_v53 = vpop.xlane.xlu1 %310 }
 0x253   :  { %v307_v56 = vmul.f32 1.442695, %v306_v51  ;;  %v312_v57 = vsub.f32 %v862_v54, %v311_v53 }
 0x254   :  { %v317_v58 = vpop.xlane.xlu0 %316 }
 0x255   :  { %673 = vpow2.f32 %v307_v56  ;;  %v318_v60 = vsub.f32 %v868_v59, %v317_v58  ;;  %v313_v61 = vmul.f32 1.442695, %v312_v57 }
 0x256   :  { %675 = vpow2.f32 %v301_v52 }
 0x257   :  { %v319_v62 = vmul.f32 1.442695, %v318_v60 }
 0x259   :  { %677 = vpow2.f32 %v319_v62 }
 0x25a   :  { %679 = vpow2.f32 %v313_v61 }
 0x262   :  { %v674_v63 = vpop.eup %673 }
 0x263   :  { %v676_v0 = vpop.eup %675  ;;  %449 = vmatprep.mubr.f32.mxu1 %v674_v63 }
 0x264   :  { %450 = vmatmul.mubr.f32.vlgmr.msra.gmra.mxu1 %v676_v0 }
 0x266   :  { %v678_v50 = vpop.eup %677 }
 0x267   :  { %v680_v55 = vpop.eup %679  ;;  %519 = vmatprep.mubr.f32.mxu0 %v678_v50 }
 0x268   :  { %520 = vmatmul.mubr.f32.vlgmr.msra.gmra.mxu0 %v680_v55 }
 0x324   :  { %v601_v1 = vpop.f32.mrf.mxu1 }
 0x326   :  { %v602_v2 = vpop.f32.mrf.mxu1 }
 0x327   :  { %v603_v4 = vadd.f32 %v602_v2, %v601_v1 }
 0x328   :  { %v636_v54 = vpop.f32.mrf.mxu0 }
 0x32a   :  { %v637_v3 = vpop.f32.mrf.mxu0 }
 0x32b   :  { %v638_v5 = vadd.f32 %v637_v3, %v636_v54 }
 0x32d   :  { %v522_v59 = vadd.f32 %v638_v5, %v603_v4 }
 0x32f   :  { %681 = vrcp.f32 %v522_v59 }
 0x33c   :  { %v682_v6 = vpop.eup %681 }
 0x33d   :  { %527 = vrot.lane.b32.xlu0 %v682_v6, %s793_s25 }
 0x3af   :  { %v528_v7 = vpop.permute.xlu0 %527 }
 0x3b0   :  { %v530_v8 = vmul.f32 %v528_v7, %v522_v59 }
 0x3b2   :  { %532 = vrot.lane.b32.xlu1 %v530_v8, %s804_s4 }
 0x424   :  { %v533_v9 = vpop.permute.xlu1 %532 }
 0x425   :  { %536 = vst.msk [vmem:[#allocation10] sm:$0xf] %vm535_vm4, %v533_v9 }
 0x426   :  { %774 = shalt.err (!%p771_p10)
}
 0x427   :  { %546 = dma.vmem_to_hbm [thread:$0]  %s544_s23, 64, %s890_s6, [#allocation4]  }
 0x428   :  { %789 = dma.done.wait [#allocation4], 64  }
 0x429   :  { %790 = vsyncadd [#allocation4], 4294967232 }
 0x42a   :  { %550 = vsyncpa [#allocation3], 1 }
 0x42b   :  { %551 = vsyncpa [#allocation6], 1 }
 0x42c   :  { %552 = vsyncpa [#allocation9], 1 }
 0x42d   :  { %553 = vsyncpa [#allocation4], 1 }

// kernel: tpu_custom_call.1
= control target key start
LH: loop header
LB: loop body
LE: loop exit
PB: predicated region body
PF: predicated region fallthrough
CT: control target
= control target key end

     0   :  { %11 = vsyncpa [#allocation3], 0  ;;  %s884_s0 = inlined_call_operand.hbm [shape: bf16[4,16], index: 0, kind: input, shape index: {}]   ;;  %s885_s1 = inlined_call_operand.hbm [shape: bf16[16,32], index: 1, kind: input, shape index: {}]   ;;  %s886_s2 = inlined_call_operand.vmem [shape: f32[1,32], index: 2, kind: input, shape index: {}]   ;;  %s887_s3 = inlined_call_operand.hbm [shape: bf16[32,512], index: 3, kind: input, shape index: {}]   ;;  %s888_s4 = inlined_call_operand.vmem [shape: f32[1,512], index: 4, kind: input, shape index: {}]   ;;  %s889_s5 = inlined_call_operand.hbm [shape: f32[512,128], index: 5, kind: input, shape index: {}]   ;;  %s890_s6 = inlined_call_operand.hbm [shape: f32[4,4], index: 6, kind: output, shape index: {}]  }
   0x1   :  { %12 = vsyncpa [#allocation6], 0 }
   0x2   :  { %13 = vsyncpa [#allocation9], 0 }
   0x3   :  { %14 = vsyncpa [#allocation4], 0  ;;  %s791_s21 = smov [#allocation5]  }
   0x4   :  { %s30_s22 = sshll.u32 %s791_s21, 4  ;;  %s31_s22 = int_to_ptr.vmem [resolvable:$true] %s30_s22 }
   0x5   :  { %s691_s23 = scalar_lea.vmem %s31_s22, 128  ;;  %p696_p1 = scmp.lt.s32.totalorder %s31_s22, %s31_s22 }
   0x6   :  { %p692_p0 = scmp.ne.s32.totalorder %s31_s22, %s691_s23  ;;  %p697_p2 = scmp.lt.s32.totalorder %s691_s23, %s691_s23 }
   0x8   :  { %p698_p3 = por %p697_p2, %p696_p1 }
   0xa   :  { %p699_p4 = pnand %p698_p3, %p692_p0 }
   0xc   :  { %702 = shalt.err (!%p699_p4)
}
   0xd   :  { %s792_s24 = smov 64   ;;  %s793_s25 = smov 4  }
   0xe   :  { %36 = dma.hbm_to_vmem [thread:$0]  %s885_s1, 128, %s31_s22, [#allocation6], %s792_s24, %s792_s24, %s793_s25  }
   0xf   :  { %s794_s28 = smov [#allocation2]   ;;  %s795_s30 = smov [#allocation7]  }
  0x10   :  { %s21_s29 = sshll.u32 %s794_s28, 4  ;;  %s44_s7 = sshll.u32 %s795_s30, 4  ;;  %s22_s29 = int_to_ptr.vmem [resolvable:$true] %s21_s29  ;;  %s45_s7 = int_to_ptr.vmem [resolvable:$true] %s44_s7 }
  0x11   :  { %s711_s8 = scalar_lea.vmem %s22_s29, 32  ;;  %p716_p6 = scmp.lt.s32.totalorder %s22_s29, %s22_s29 }
  0x12   :  { %p712_p5 = scmp.ne.s32.totalorder %s22_s29, %s711_s8  ;;  %p717_p7 = scmp.lt.s32.totalorder %s711_s8, %s711_s8 }
  0x14   :  { %p718_p8 = por %p717_p7, %p716_p6 }
  0x16   :  { %p719_p9 = pnand %p718_p8, %p712_p5 }
  0x18   :  { %722 = shalt.err (!%p719_p9)
}
  0x19   :  { %24 = dma.hbm_to_vmem [thread:$0]  %s884_s0, 32, %s22_s29, [#allocation3]  }
  0x1a   :  { %s731_s11 = scalar_lea.vmem %s45_s7, 1024  ;;  %p736_p11 = scmp.lt.s32.totalorder %s45_s7, %s45_s7 }
  0x1b   :  { %p732_p10 = scmp.ne.s32.totalorder %s45_s7, %s731_s11  ;;  %p737_p12 = scmp.lt.s32.totalorder %s731_s11, %s731_s11 }
  0x1d   :  { %p738_p13 = por %p737_p12, %p736_p11 }
  0x1f   :  { %p739_p0 = pnand %p738_p13, %p732_p10 }
  0x21   :  { %742 = shalt.err (!%p739_p0)
}
  0x22   :  { %s796_s1 = smov 256   ;;  %s797_s12 = smov 16  }
  0x23   :  { %50 = dma.hbm_to_vmem [thread:$0]  %s887_s3, 1024, %s45_s7, [#allocation6], %s796_s1, %s796_s1, %s797_s12  }
  0x24   :  { %s798_s15 = smov [#allocation8]  }
  0x25   :  { %s58_s16 = sshll.u32 %s798_s15, 4  ;;  %s59_s16 = int_to_ptr.vmem [resolvable:$true] %s58_s16 }
  0x26   :  { %s751_s17 = scalar_lea.vmem %s59_s16, 8192  ;;  %p756_p2 = scmp.lt.s32.totalorder %s59_s16, %s59_s16 }
  0x27   :  { %p752_p1 = scmp.ne.s32.totalorder %s59_s16, %s751_s17  ;;  %p757_p3 = scmp.lt.s32.totalorder %s751_s17, %s751_s17 }
  0x29   :  { %p758_p4 = por %p757_p3, %p756_p2 }
  0x2b   :  { %p759_p5 = pnand %p758_p4, %p752_p1 }
  0x2d   :  { %762 = shalt.err (!%p759_p5)
}
  0x2e   :  { %s799_s0 = smov 128   ;;  %s800_s18 = smov 8  }
  0x2f   :  { %64 = dma.hbm_to_vmem [thread:$0]  %s889_s5, 8192, %s59_s16, [#allocation9], %s799_s0, %s799_s0, %s800_s18  }
  0x30   :  { %783 = dma.done.wait [#allocation3], 32  }
  0x31   :  { %784 = vsyncadd [#allocation3], 4294967264 }
  0x32   :  { %785 = dma.done.wait [#allocation6], 1152  }
  0x33   :  { %786 = vsyncadd [#allocation6], 4294966144 }
  0x34   :  { %787 = dma.done.wait [#allocation9], 8192  }
  0x35   :  { %788 = vsyncadd [#allocation9], 4294959104  ;;  %v801_v0 = vmov 0.0   ;;  %vm802_vm0 = vmmov 0   ;;  %v660_v1 = vld [vmem:[#allocation5] sm:$0xff]   ;;  %vm94_vm1 = vcmask 130048   ;;  %v150_v38 = vlaneseq }
  0x36   :  { %639 = vmatprep.subr.bf16.mxu0 %v801_v0  ;;  %641 = vmatprep.mubr.msk.bf16.mxu0 %vm802_vm0, %v801_v0  ;;  %v78_v2 = vld [vmem:[#allocation2] sm:$0x3]  ;;  %v663_v4 = vld [vmem:[#allocation7 + $0x28] ss:$16 sps:$4 sm:$0xff]   ;;  %v665_v5 = vld [vmem:[#allocation7 + $0x2c] ss:$16 sps:$4 sm:$0xff]  }
  0x37   :  { %640 = vmatpush3.bf16.msra.mxu0 %v660_v1  ;;  %v661_v3 = vld [vmem:[#allocation7 + $0x24] ss:$16 sps:$4 sm:$0xff]   ;;  %v666_v6 = vld [vmem:[#allocation7 + $0x20] ss:$16 sps:$4 sm:$0xff]   ;;  %v671_v8 = vld [vmem:[#allocation7 + $0xc] ss:$16 sps:$4 sm:$0xff]  }
  0x38   :  { %226 = vmatprep.subr.bf16.mxu1 %v661_v3  ;;  %267 = vmatprep.subr.bf16.mxu0 %v665_v5  ;;  %v667_v7 = vld [vmem:[#allocation7 + $0x4] ss:$16 sps:$4 sm:$0xff]   ;;  %v669_v9 = vld [vmem:[#allocation7 + $0x8] ss:$16 sps:$4 sm:$0xff]   ;;  %v672_v10 = vld [vmem:[#allocation7] ss:$16 sps:$4 sm:$0xff]  }
  0x39   :  { %227 = vmatpush1.bf16.msra.mxu1 %v666_v6  ;;  %v803_v11 = vmov 0   ;;  %v554_v12 = vld [vmem:[%s886_s2] ss:$0 sm:$0xff]  ;;  %vm210_vm2 = vcmask 261120   ;;  %v352_v20 = vld [vmem:[#allocation8 + $0xf8] sm:$0xff]  ;;  %v351_v22 = vld [vmem:[#allocation8 + $0xf0] sm:$0xff] }
  0x3a   :  { %642 = vmatmul.mubr.msk.bf16.vlgmr.msra.gmra.mxu0 %vm94_vm1, %v78_v2  ;;  %228 = vmatprep.subr.bf16.mxu1 %v667_v7  ;;  %v336_v21 = vld [vmem:[#allocation8 + $0x78] sm:$0xff]  ;;  %v335_v23 = vld [vmem:[#allocation8 + $0x70] sm:$0xff]  ;;  %v350_v25 = vld [vmem:[#allocation8 + $0xe8] sm:$0xff]  ;;  %v151_v39 = vshrl.u32 %v150_v38, 7  ;;  %vm296_vm3 = vcmask 1043456   ;;  %s805_s22 = smov [#allocation10]  }
  0x3b   :  { %268 = vmatpush1.bf16.msra.mxu0 %v663_v4  ;;  %246 = vmatprep.mubr.bf16.mxu1 %v803_v11  ;;  %v384_v24 = vld [vmem:[#allocation8 + $0x1f8] sm:$0xff]  ;;  %v334_v27 = vld [vmem:[#allocation8 + $0x68] sm:$0xff]  ;;  %v383_v28 = vld [vmem:[#allocation8 + $0x1f0] sm:$0xff]  ;;  %s543_s23 = sshll.u32 %s805_s22, 4  ;;  %vm535_vm4 = vcmask 27648   ;;  %s544_s23 = int_to_ptr.vmem [resolvable:$true] %s543_s23 }
  0x3c   :  { %269 = vmatprep.subr.bf16.mxu0 %v671_v8  ;;  %287 = vmatprep.mubr.bf16.mxu0 %v803_v11  ;;  %v368_v26 = vld [vmem:[#allocation8 + $0x178] sm:$0xff]  ;;  %v367_v29 = vld [vmem:[#allocation8 + $0x170] sm:$0xff]  ;;  %v349_v30 = vld [vmem:[#allocation8 + $0xe0] sm:$0xff]  ;;  %v152_v40 = vsub.s32 0, %v151_v39  ;;  %v160_v42 = vsub.s32 2, %v151_v39  ;;  %v156_v43 = vsub.s32 1, %v151_v39  ;;  %p768_p7 = scmp.lt.s32.totalorder %s544_s23, %s544_s23 }
  0x3d   :  { %229 = vmatpush1.bf16.msra.mxu1 %v672_v10  ;;  %v382_v31 = vld [vmem:[#allocation8 + $0x1e8] sm:$0xff]  ;;  %v333_v32 = vld [vmem:[#allocation8 + $0x60] sm:$0xff]  ;;  %v348_v35 = vld [vmem:[#allocation8 + $0xd8] sm:$0xff]  ;;  %v164_v45 = vsub.s32 3, %v151_v39  ;;  %s763_s24 = scalar_lea.vmem %s544_s23, 64 }
  0x3e   :  { %569 = vmatprep.subr.mxu1 %v352_v20  ;;  %v366_v33 = vld [vmem:[#allocation8 + $0x168] sm:$0xff]  ;;  %v381_v34 = vld [vmem:[#allocation8 + $0x1e0] sm:$0xff]  ;;  %v332_v36 = vld [vmem:[#allocation8 + $0x58] sm:$0xff]  ;;  %p764_p6 = scmp.ne.s32.totalorder %s544_s23, %s763_s24  ;;  %p769_p8 = scmp.lt.s32.totalorder %s763_s24, %s763_s24 }
  0x3f   :  { %270 = vmatpush1.bf16.msra.mxu0 %v669_v9  ;;  %v347_v37 = vld [vmem:[#allocation8 + $0xd0] sm:$0xff]  ;;  %v365_v2 = vld [vmem:[#allocation8 + $0x160] sm:$0xff]  ;;  %v346_v3 = vld [vmem:[#allocation8 + $0xc8] sm:$0xff] }
  0x40   :  { %604 = vmatprep.subr.mxu0 %v384_v24  ;;  %v148_v41 = vld [vmem:[%s888_s4] sm:$0xf]  ;;  %v380_v4 = vld [vmem:[#allocation8 + $0x1d8] sm:$0xff]  ;;  %v345_v7 = vld [vmem:[#allocation8 + $0xc0] sm:$0xff]  ;;  %s804_s4 = smov 124   ;;  %p770_p9 = por %p769_p8, %p768_p7 }
  0x41   :  { %v153_v44 = vrot.slane %v148_v41, %v152_v40  ;;  %v161_v46 = vrot.slane %v148_v41, %v160_v42  ;;  %v157_v47 = vrot.slane %v148_v41, %v156_v43  ;;  %v165_v51 = vrot.slane %v148_v41, %v164_v45  ;;  %v331_v1 = vld [vmem:[#allocation8 + $0x50] sm:$0xff]  ;;  %v330_v5 = vld [vmem:[#allocation8 + $0x48] sm:$0xff]  ;;  %v364_v6 = vld [vmem:[#allocation8 + $0x158] sm:$0xff] }
  0x42   :  { %v379_v8 = vld [vmem:[#allocation8 + $0x1d0] sm:$0xff]  ;;  %v329_v9 = vld [vmem:[#allocation8 + $0x40] sm:$0xff]  ;;  %v344_v11 = vld [vmem:[#allocation8 + $0xb8] sm:$0xff]  ;;  %p771_p10 = pnand %p770_p9, %p764_p6 }
  0x43   :  { %v363_v10 = vld [vmem:[#allocation8 + $0x150] sm:$0xff]  ;;  %v376_v20 = vld [vmem:[#allocation8 + $0x1b8] sm:$0xff]  ;;  %v337_v39 = vld [vmem:[#allocation8 + $0x80] sm:$0xff] }
  0x44   :  { %v375_v24 = vld [vmem:[#allocation8 + $0x1b0] sm:$0xff]  ;;  %v356_v38 = vld [vmem:[#allocation8 + $0x118] sm:$0xff]  ;;  %v321_v41 = vld [vmem:[#allocation8] sm:$0xff] }
  0x45   :  { %v371_v40 = vld [vmem:[#allocation8 + $0x190] sm:$0xff]  ;;  %v370_v43 = vld [vmem:[#allocation8 + $0x188] sm:$0xff]  ;;  %v369_v45 = vld [vmem:[#allocation8 + $0x180] sm:$0xff] }
  0x46   :  { %v355_v42 = vld [vmem:[#allocation8 + $0x110] sm:$0xff] }
  0xfa   :  { %v132_v13 = vpop.f32.mrf.mxu0 }
  0xfb   :  { %v133_v14 = vadd.f32 %v554_v12, %v132_v13  ;;  %v378_v12 = vld [vmem:[#allocation8 + $0x1c8] sm:$0xff]  ;;  %v328_v13 = vld [vmem:[#allocation8 + $0x38] sm:$0xff] }
  0xfc   :  { %v643_v15 = vpop.f32.mrf.mxu0 }
  0xfd   :  { %v138_v16 = vmax.f32 %v133_v14, 0.0  ;;  %v362_v14 = vld [vmem:[#allocation8 + $0x148] sm:$0xff]  ;;  %v343_v15 = vld [vmem:[#allocation8 + $0xb0] sm:$0xff] }
  0xfe   :  { %v135_v17 = vpop.f32.mrf.mxu0 }
  0xff   :  { %v139_v18 = vpack.c.bf16 %v138_v16, %v138_v16  ;;  %v377_v16 = vld [vmem:[#allocation8 + $0x1c0] sm:$0xff]  ;;  %v327_v17 = vld [vmem:[#allocation8 + $0x30] sm:$0xff] }
 0x100   :  { %v644_v19 = vpop.f32.mrf.mxu0 }
 0x101   :  { %565 = vmatmul.mubr.msk.bf16.vlgmr.msra.gmra.mxu1 %vm210_vm2, %v139_v18  ;;  %566 = vmatmul.mubr.msk.bf16.vlgmr.msra.gmra.mxu0 %vm210_vm2, %v139_v18  ;;  %v361_v18 = vld [vmem:[#allocation8 + $0x140] sm:$0xff]  ;;  %v342_v19 = vld [vmem:[#allocation8 + $0xa8] sm:$0xff] }
 0x102   :  { %570 = vmatpush3.msra.mxu1 %v336_v21  ;;  %605 = vmatpush3.msra.mxu0 %v368_v26  ;;  %v326_v21 = vld [vmem:[#allocation8 + $0x28] sm:$0xff]  ;;  %v359_v26 = vld [vmem:[#allocation8 + $0x130] sm:$0xff] }
 0x103   :  { %571 = vmatprep.subr.mxu1 %v351_v22  ;;  %606 = vmatprep.subr.mxu0 %v383_v28  ;;  %v360_v22 = vld [vmem:[#allocation8 + $0x138] sm:$0xff]  ;;  %v374_v28 = vld [vmem:[#allocation8 + $0x1a8] sm:$0xff] }
 0x104   :  { %572 = vmatpush3.msra.mxu1 %v335_v23  ;;  %607 = vmatpush3.msra.mxu0 %v367_v29  ;;  %v341_v23 = vld [vmem:[#allocation8 + $0xa0] sm:$0xff]  ;;  %v324_v29 = vld [vmem:[#allocation8 + $0x18] sm:$0xff] }
 0x105   :  { %573 = vmatprep.subr.mxu1 %v350_v25  ;;  %608 = vmatprep.subr.mxu0 %v382_v31  ;;  %v325_v25 = vld [vmem:[#allocation8 + $0x20] sm:$0xff]  ;;  %v339_v31 = vld [vmem:[#allocation8 + $0x90] sm:$0xff] }
 0x106   :  { %574 = vmatpush3.msra.mxu1 %v334_v27  ;;  %609 = vmatpush3.msra.mxu0 %v366_v33  ;;  %v340_v27 = vld [vmem:[#allocation8 + $0x98] sm:$0xff]  ;;  %v323_v33 = vld [vmem:[#allocation8 + $0x10] sm:$0xff] }
 0x107   :  { %575 = vmatprep.subr.mxu1 %v349_v30  ;;  %610 = vmatprep.subr.mxu0 %v381_v34  ;;  %v358_v30 = vld [vmem:[#allocation8 + $0x128] sm:$0xff]  ;;  %v357_v34 = vld [vmem:[#allocation8 + $0x120] sm:$0xff] }
 0x108   :  { %576 = vmatpush3.msra.mxu1 %v333_v32  ;;  %611 = vmatpush3.msra.mxu0 %v365_v2  ;;  %v373_v32 = vld [vmem:[#allocation8 + $0x1a0] sm:$0xff] }
 0x109   :  { %577 = vmatprep.subr.mxu1 %v348_v35  ;;  %612 = vmatprep.subr.mxu0 %v380_v4  ;;  %v338_v35 = vld [vmem:[#allocation8 + $0x88] sm:$0xff] }
 0x10a   :  { %578 = vmatpush3.msra.mxu1 %v332_v36  ;;  %613 = vmatpush3.msra.mxu0 %v364_v6  ;;  %v372_v36 = vld [vmem:[#allocation8 + $0x198] sm:$0xff] }
 0x10b   :  { %579 = vmatprep.subr.mxu1 %v347_v37  ;;  %614 = vmatprep.subr.mxu0 %v379_v8  ;;  %v322_v37 = vld [vmem:[#allocation8 + $0x8] sm:$0xff] }
 0x10c   :  { %580 = vmatpush3.msra.mxu1 %v331_v1  ;;  %615 = vmatpush3.msra.mxu0 %v363_v10 }
 0x10d   :  { %581 = vmatprep.subr.mxu1 %v346_v3  ;;  %616 = vmatprep.subr.mxu0 %v378_v12 }
 0x10e   :  { %582 = vmatpush3.msra.mxu1 %v330_v5  ;;  %617 = vmatpush3.msra.mxu0 %v362_v14 }
 0x10f   :  { %583 = vmatprep.subr.mxu1 %v345_v7  ;;  %618 = vmatprep.subr.mxu0 %v377_v16 }
 0x110   :  { %584 = vmatpush3.msra.mxu1 %v329_v9  ;;  %619 = vmatpush3.msra.mxu0 %v361_v18 }
 0x111   :  { %585 = vmatprep.subr.mxu1 %v344_v11  ;;  %620 = vmatprep.subr.mxu0 %v376_v20 }
 0x112   :  { %586 = vmatpush3.msra.mxu1 %v328_v13  ;;  %621 = vmatpush3.msra.mxu0 %v360_v22 }
 0x113   :  { %587 = vmatprep.subr.mxu1 %v343_v15  ;;  %622 = vmatprep.subr.mxu0 %v375_v24 }
 0x114   :  { %588 = vmatpush3.msra.mxu1 %v327_v17  ;;  %623 = vmatpush3.msra.mxu0 %v359_v26 }
 0x115   :  { %589 = vmatprep.subr.mxu1 %v342_v19  ;;  %624 = vmatprep.subr.mxu0 %v374_v28 }
 0x116   :  { %590 = vmatpush3.msra.mxu1 %v326_v21  ;;  %625 = vmatpush3.msra.mxu0 %v358_v30 }
 0x117   :  { %591 = vmatprep.subr.mxu1 %v341_v23  ;;  %626 = vmatprep.subr.mxu0 %v373_v32 }
 0x118   :  { %592 = vmatpush3.msra.mxu1 %v325_v25  ;;  %627 = vmatpush3.msra.mxu0 %v357_v34 }
 0x119   :  { %593 = vmatprep.subr.mxu1 %v340_v27  ;;  %628 = vmatprep.subr.mxu0 %v372_v36 }
 0x11a   :  { %594 = vmatpush3.msra.mxu1 %v324_v29  ;;  %629 = vmatpush3.msra.mxu0 %v356_v38 }
 0x11b   :  { %595 = vmatprep.subr.mxu1 %v339_v31  ;;  %630 = vmatprep.subr.mxu0 %v371_v40 }
 0x11c   :  { %596 = vmatpush3.msra.mxu1 %v323_v33  ;;  %631 = vmatpush3.msra.mxu0 %v355_v42 }
 0x11d   :  { %597 = vmatprep.subr.mxu1 %v338_v35  ;;  %632 = vmatprep.subr.mxu0 %v370_v43 }
 0x11e   :  { %598 = vmatpush3.msra.mxu1 %v322_v37 }
 0x11f   :  { %599 = vmatprep.subr.mxu1 %v337_v39 }
 0x120   :  { %600 = vmatpush3.msra.mxu1 %v321_v41 }
 0x1c1   :  { %v248_v48 = vpop.f32.mrf.mxu1  ;;  %v289_v49 = vpop.f32.mrf.mxu0 }
 0x1c2   :  { %v860_v50 = vadd.f32 %v248_v48, %v153_v44  ;;  %v862_v54 = vadd.f32 %v289_v49, %v161_v46  ;;  %v354_v44 = vld [vmem:[#allocation8 + $0x108] sm:$0xff]  ;;  %v353_v46 = vld [vmem:[#allocation8 + $0x100] sm:$0xff] }
 0x1c3   :  { %v250_v52 = vpop.f32.mrf.mxu1  ;;  %v291_v53 = vpop.f32.mrf.mxu0  ;;  %633 = vmatpush3.msra.mxu0 %v354_v44 }
 0x1c4   :  { %v864_v55 = vadd.f32 %v250_v52, %v157_v47  ;;  %v297_v56 = vsel %vm296_vm3, %v860_v50, -inf  ;;  %v868_v59 = vadd.f32 %v291_v53, %v165_v51  ;;  %v309_v63 = vsel %vm296_vm3, %v862_v54, -inf  ;;  %634 = vmatprep.subr.mxu0 %v369_v45 }
 0x1c5   :  { %v252_v57 = vpop.f32.mrf.mxu1  ;;  %298 = vmax.xlane.f32.xlu1 %v297_v56  ;;  %v293_v58 = vpop.f32.mrf.mxu0  ;;  %635 = vmatpush3.msra.mxu0 %v353_v46 }
 0x1c6   :  { %v303_v60 = vsel %vm296_vm3, %v864_v55, -inf  ;;  %v315_v0 = vsel %vm296_vm3, %v868_v59, -inf }
 0x1c7   :  { %v253_v61 = vpop.f32.mrf.mxu1  ;;  %304 = vmax.xlane.f32.xlu0 %v303_v60  ;;  %v294_v62 = vpop.f32.mrf.mxu0 }
 0x1c9   :  { %310 = vmax.xlane.f32.xlu1 %v309_v63 }
 0x1cb   :  { %316 = vmax.xlane.f32.xlu0 %v315_v0 }
 0x24e   :  { %v299_v47 = vpop.xlane.xlu1 %298 }
 0x24f   :  { %v300_v48 = vsub.f32 %v860_v50, %v299_v47 }
 0x250   :  { %v305_v49 = vpop.xlane.xlu0 %304 }
 0x251   :  { %v306_v51 = vsub.f32 %v864_v55, %v305_v49  ;;  %v301_v52 = vmul.f32 1.442695, %v300_v48 }
 0x252   :  { %v311_v53 = vpop.xlane.xlu1 %310 }
 0x253   :  { %v307_v56 = vmul.f32 1.442695, %v306_v51  ;;  %v312_v57 = vsub.f32 %v862_v54, %v311_v53 }
 0x254   :  { %v317_v58 = vpop.xlane.xlu0 %316 }
 0x255   :  { %673 = vpow2.f32 %v307_v56  ;;  %v318_v60 = vsub.f32 %v868_v59, %v317_v58  ;;  %v313_v61 = vmul.f32 1.442695, %v312_v57 }
 0x256   :  { %675 = vpow2.f32 %v301_v52 }
 0x257   :  { %v319_v62 = vmul.f32 1.442695, %v318_v60 }
 0x259   :  { %677 = vpow2.f32 %v319_v62 }
 0x25a   :  { %679 = vpow2.f32 %v313_v61 }
 0x262   :  { %v674_v63 = vpop.eup %673 }
 0x263   :  { %v676_v0 = vpop.eup %675  ;;  %449 = vmatprep.mubr.f32.mxu1 %v674_v63 }
 0x264   :  { %450 = vmatmul.mubr.f32.vlgmr.msra.gmra.mxu1 %v676_v0 }
 0x266   :  { %v678_v50 = vpop.eup %677 }
 0x267   :  { %v680_v55 = vpop.eup %679  ;;  %519 = vmatprep.mubr.f32.mxu0 %v678_v50 }
 0x268   :  { %520 = vmatmul.mubr.f32.vlgmr.msra.gmra.mxu0 %v680_v55 }
 0x324   :  { %v601_v1 = vpop.f32.mrf.mxu1 }
 0x326   :  { %v602_v2 = vpop.f32.mrf.mxu1 }
 0x327   :  { %v603_v4 = vadd.f32 %v602_v2, %v601_v1 }
 0x328   :  { %v636_v54 = vpop.f32.mrf.mxu0 }
 0x32a   :  { %v637_v3 = vpop.f32.mrf.mxu0 }
 0x32b   :  { %v638_v5 = vadd.f32 %v637_v3, %v636_v54 }
 0x32d   :  { %v522_v59 = vadd.f32 %v638_v5, %v603_v4 }
 0x32f   :  { %681 = vrcp.f32 %v522_v59 }
 0x33c   :  { %v682_v6 = vpop.eup %681 }
 0x33d   :  { %527 = vrot.lane.b32.xlu0 %v682_v6, %s793_s25 }
 0x3af   :  { %v528_v7 = vpop.permute.xlu0 %527 }
 0x3b0   :  { %v530_v8 = vmul.f32 %v528_v7, %v522_v59 }
 0x3b2   :  { %532 = vrot.lane.b32.xlu1 %v530_v8, %s804_s4 }
 0x424   :  { %v533_v9 = vpop.permute.xlu1 %532 }
 0x425   :  { %536 = vst.msk [vmem:[#allocation10] sm:$0xf] %vm535_vm4, %v533_v9 }
 0x426   :  { %774 = shalt.err (!%p771_p10)
}
 0x427   :  { %546 = dma.vmem_to_hbm [thread:$0]  %s544_s23, 64, %s890_s6, [#allocation4]  }
 0x428   :  { %789 = dma.done.wait [#allocation4], 64  }
 0x429   :  { %790 = vsyncadd [#allocation4], 4294967232 }
 0x42a   :  { %550 = vsyncpa [#allocation3], 1 }
 0x42b   :  { %551 = vsyncpa [#allocation6], 1 }
 0x42c   :  { %552 = vsyncpa [#allocation9], 1 }
 0x42d   :  { %553 = vsyncpa [#allocation4], 1 }

</bundles_post_ra>
